<compile_context>
chip_gen: v5e
topology: v5e:2x2
jax: 0.10.0
libtpu: 0.0.40
codegen_flags: <defaults>
</compile_context>

<pallas_src>
import functools

import jax
import jax.numpy as jnp
from jax.experimental import pallas as pl
from jax.experimental.pallas import tpu as pltpu


def _round_up(x, m):
    return ((x + m - 1) // m) * m


@functools.lru_cache(maxsize=1)
def _vmem_limit_bytes():
    """Scoped-VMEM limit derived from the actual chip generation."""
    try:
        physical = pltpu.get_tpu_info().vmem_capacity_bytes
    except Exception:
        physical = 64 * 1024 * 1024          # conservative (v7x-sized) fallback
    # ~3/4 of physical, capped at 64 MiB: v5e/v6e (128 MiB) -> 64 MiB,
    # v7x (64 MiB) -> 48 MiB, leaving room for double-buffered inputs.
    return int(min((physical * 3) // 4, 64 * 1024 * 1024))


def _choose_tile(hw, c, in_dtype, tgt_dtype, max_tile_lanes=None):
    """Pick the lane-tile THW and the number of lane tiles n_t.

    When the whole spatial extent fits the VMEM budget, THW == hw (a single
    full-extent tile, legal at any alignment, no masking).  Otherwise THW is
    a multiple of 128 and the trailing tile is ragged (masked in-kernel).
    """
    in_itemsize = jnp.dtype(in_dtype).itemsize
    tgt_itemsize = jnp.dtype(tgt_dtype).itemsize
    # Sublane-padded row counts (8 rows per 32-bit vreg; packed dtypes pad to
    # 8 * (4 // itemsize) rows).
    c_pad_f32 = _round_up(c, 8)
    c_pad_in = _round_up(c, 8 * max(1, 4 // in_itemsize))
    tgt_rows = 8 * max(1, 4 // tgt_itemsize)

    bytes_per_lane = (
        2 * c_pad_in * in_itemsize      # double-buffered logits block
        + 2 * tgt_rows * tgt_itemsize   # double-buffered label block
        + 5 * c_pad_f32 * 4             # live (C, THW) f32 temporaries
        + 6 * 8 * 4                     # (1, THW) temporaries (max/denom/...)
    )
    budget = int(_vmem_limit_bytes() * 0.85)
    cap = max(128, (budget // bytes_per_lane // 128) * 128)
    if max_tile_lanes is not None:
        cap = max(128, min(cap, (max_tile_lanes // 128) * 128))

    if hw <= cap:
        return hw, 1                    # single tile == full extent
    n_t = (hw + cap - 1) // cap
    return cap, n_t


def _choose_split(batch, n_t):
    """Split the lane-tile axis in two "parallel" halves when the batch alone
    would leave a v7x TensorCore idle (harmless on 1-TC chips)."""
    if batch % 2 == 1 and n_t >= 2 and n_t % 2 == 0:
        return 2
    return 1


def _iou_sums_kernel(tgt_ref, logit_ref, inter_ref, card_ref, *, tail_lanes):
    s = pl.program_id(1)
    t = pl.program_id(2)

    @pl.when(t == 0)
    def _():
        inter_ref[...] = jnp.zeros_like(inter_ref)
        card_ref[...] = jnp.zeros_like(card_ref)

    def accumulate(valid_lanes):
        logits = logit_ref[...].astype(jnp.float32)           # (C, THW)
        c, thw = logits.shape
        tgt = tgt_ref[...].astype(jnp.int32)                  # (1, THW)

        if valid_lanes is not None:
            lane = jax.lax.broadcasted_iota(jnp.int32, (1, thw), 1)
            valid = lane < valid_lanes                        # (1, THW)
            # Zero out-of-bounds lanes BEFORE exp (garbage reads must not
            # produce Inf/NaN) and point their label at no class.
            logits = jnp.where(valid, logits, 0.0)
            tgt = jnp.where(valid, tgt, -1)

        # Softmax over the class (sublane) axis.
        m = jnp.max(logits, axis=0, keepdims=True)            # (1, THW)
        e = jnp.exp(logits - m)                               # (C, THW)
        denom = jnp.sum(e, axis=0, keepdims=True)             # (1, THW)
        r = pl.reciprocal(denom, approx=True)
        r = r * (2.0 - denom * r)        # one Newton step, (1, THW) only
        probas = e * r                                        # (C, THW)

        # One-hot match: (C, 1) sublane iota broadcast against the (1, THW)
        # labels -- no materialized (C, THW) class-id tensor.
        class_ids = jax.lax.broadcasted_iota(jnp.int32, (c, 1), 0)
        match = class_ids == tgt                              # (C, THW)

        if valid_lanes is not None:
            # Padded lanes must not add their uniform softmax mass.
            probas = jnp.where(valid, probas, 0.0)

        inter_ref[...] += jnp.sum(
            jnp.where(match, probas, 0.0), axis=1, keepdims=True)      # (C, 1)
        # Fused cardinality: a single lane reduction of probas + one_hot.
        card_ref[...] += jnp.sum(
            probas + match.astype(jnp.float32), axis=1, keepdims=True)  # (C, 1)

    if tail_lanes is None:
        accumulate(None)
    else:
        # Only the single ragged trailing tile pays the lane mask.
        is_last = jnp.logical_and(s == pl.num_programs(1) - 1,
                                  t == pl.num_programs(2) - 1)

        @pl.when(jnp.logical_not(is_last))
        def _():
            accumulate(None)

        @pl.when(is_last)
        def _():
            accumulate(tail_lanes)


@functools.partial(jax.jit, static_argnames=("eps", "max_tile_lanes"))
def iou_loss(logits, target, eps=1e-07, max_tile_lanes=None):
    """JAX/Pallas equivalent of iou_loss(true=target, logits=logits)."""
    B, C, H, W = logits.shape
    HW = H * W

    if C == 1:
        # TODO(synk): binary (sigmoid) branch not implemented in the Pallas
        # kernel; the multi-class softmax branch is the implemented hot path.
        raise NotImplementedError("C == 1 branch not implemented")

    # Free reshapes only -- no HBM transpose, no jnp.pad.
    logits_3d = logits.reshape(B, C, HW)
    # Labels assumed in [0, C); int8 cuts label HBM traffic 4x.
    tgt_dtype = jnp.int8 if C <= 127 else jnp.int32
    target_3d = target.reshape(B, 1, HW).astype(tgt_dtype)

    THW, n_t = _choose_tile(HW, C, logits.dtype, tgt_dtype, max_tile_lanes)
    S = _choose_split(B, n_t)
    T = n_t // S

    rem = HW - (n_t - 1) * THW                 # valid lanes in the last tile
    tail_lanes = None if rem == THW else rem

    kernel = functools.partial(_iou_sums_kernel, tail_lanes=tail_lanes)

    def lane_block(b, s, t):
        return (b, 0, s * T + t)

    inter_p, card_p = pl.pallas_call(
        kernel,
        out_shape=(
            jax.ShapeDtypeStruct((B, S, C, 1), jnp.float32),
            jax.ShapeDtypeStruct((B, S, C, 1), jnp.float32),
        ),
        grid_spec=pltpu.PrefetchScalarGridSpec(
            num_scalar_prefetch=0,
            grid=(B, S, T),
            in_specs=[
                pl.BlockSpec((pl.Squeezed(), 1, THW), lane_block),
                pl.BlockSpec((pl.Squeezed(), C, THW), lane_block),
            ],
            out_specs=(
                pl.BlockSpec((pl.Squeezed(), pl.Squeezed(), C, 1),
                             lambda b, s, t: (b, s, 0, 0)),
                pl.BlockSpec((pl.Squeezed(), pl.Squeezed(), C, 1),
                             lambda b, s, t: (b, s, 0, 0)),
            ),
        ),
        compiler_params=pltpu.CompilerParams(
            dimension_semantics=("parallel", "parallel", "arbitrary"),
            vmem_limit_bytes=_vmem_limit_bytes(),
        ),
    )(target_3d, logits_3d)

    # Tiny epilogue: combine per-(batch, split) partials, per-class IoU, mean.
    inter = jnp.sum(inter_p[..., 0], axis=(0, 1))   # (C,)
    card = jnp.sum(card_p[..., 0], axis=(0, 1))     # (C,)
    iou = inter / (card - inter + eps)
    return (1.0 - jnp.mean(iou)).astype(logits.dtype)


def _iou_loss_ref(logits, target, eps=1e-07):
    """Pure-JAX reference mirroring the PyTorch implementation."""
    C = logits.shape[1]
    true_1_hot = jax.nn.one_hot(target[:, 0], C, dtype=jnp.float32)  # [B,H,W,C]
    true_1_hot = jnp.transpose(true_1_hot, (0, 3, 1, 2))             # [B,C,H,W]
    probas = jax.nn.softmax(logits.astype(jnp.float32), axis=1)
    dims = (0, 2, 3)
    intersection = jnp.sum(probas * true_1_hot, axis=dims)
    cardinality = jnp.sum(probas + true_1_hot, axis=dims)
    iou = intersection / (cardinality - intersection + eps)
    return 1.0 - jnp.mean(iou)


if __name__ == "__main__":
    key = jax.random.PRNGKey(0)
    k = jax.random.split(key, 6)

    # Case 1: lane-aligned spatial size, single full-extent tile.
    B, C, H, W = 2, 4, 16, 16
    logits = jax.random.normal(k[0], (B, C, H, W), dtype=jnp.float32)
    target = jax.random.randint(k[1], (B, 1, H, W), 0, C, dtype=jnp.int32)
    out = iou_loss(logits, target)
    jax.block_until_ready(out)
    ref = _iou_loss_ref(logits, target)
    assert jnp.allclose(out, ref, atol=1e-4, rtol=1e-4), (out, ref)

    # Case 2: non-128-multiple spatial size with forced multi-tile grid ->
    # exercises the ragged trailing block + in-kernel tail masking (no pad).
    Hb, Wb = 18, 18                       # HW = 324 -> tiles 128 / 128 / 68
    logits_b = jax.random.normal(k[2], (B, C, Hb, Wb), dtype=jnp.float32)
    target_b = jax.random.randint(k[3], (B, 1, Hb, Wb), 0, C, dtype=jnp.int32)
    out_b = iou_loss(logits_b, target_b, max_tile_lanes=128)
    jax.block_until_ready(out_b)
    ref_b = _iou_loss_ref(logits_b, target_b)
    assert jnp.allclose(out_b, ref_b, atol=1e-4, rtol=1e-4), (out_b, ref_b)

    # Case 3: batch of 1 -> the lane-tile axis is split into two "parallel"
    # halves (keeps both v7x TensorCores busy); the last tile is ragged.
    Bc, Cc, Hc, Wc = 1, 5, 30, 30         # HW = 900 -> 4 tiles of 256
    logits_c = jax.random.normal(k[4], (Bc, Cc, Hc, Wc), dtype=jnp.float32)
    target_c = jax.random.randint(k[5], (Bc, 1, Hc, Wc), 0, Cc, dtype=jnp.int32)
    out_c = iou_loss(logits_c, target_c, max_tile_lanes=256)
    jax.block_until_ready(out_c)
    ref_c = _iou_loss_ref(logits_c, target_c)
    assert jnp.allclose(out_c, ref_c, atol=1e-4, rtol=1e-4), (out_c, ref_c)

    print("KERNEL_OK")
</pallas_src>

<mosaic_0001>
module attributes {stable_mosaic.version = 11 : i64} {
  func.func @_iou_sums_kernel(%arg0: i32, %arg1: i32, %arg2: i32, %arg3: memref<1x1x256xi8, #tpu.memory_space<vmem>>, %arg4: memref<1x4x256xf32, #tpu.memory_space<vmem>>, %arg5: memref<1x1x4x1xf32, #tpu.memory_space<vmem>>, %arg6: memref<1x1x4x1xf32, #tpu.memory_space<vmem>>) attributes {dimension_semantics = [#tpu.dimension_semantics<parallel>, #tpu.dimension_semantics<parallel>, #tpu.dimension_semantics<arbitrary>], iteration_bounds = array<i64: 2, 1, 1>, scalar_prefetch = 0 : i64, scratch_operands = 0 : i64, tpu.core_type = #tpu.core_type<tc>, window_params = [{transform_indices = @transform_0, window_bounds = array<i64: 1, 1, 256>}, {transform_indices = @transform_1, window_bounds = array<i64: 1, 4, 256>}, {transform_indices = @transform_2, window_bounds = array<i64: 1, 1, 4, 1>}, {transform_indices = @transform_3, window_bounds = array<i64: 1, 1, 4, 1>}]} {
    %c0_i32 = arith.constant 0 : i32
    %0 = arith.cmpi eq, %arg2, %c0_i32 : i32
    %1 = arith.extui %0 : i1 to i32
    %c0_i32_0 = arith.constant 0 : i32
    %2 = arith.cmpi ne, %1, %c0_i32_0 : i32
    scf.if %2 {
      %cst_27 = arith.constant 0.000000e+00 : f32
      %47 = vector.broadcast %cst_27 : f32 to vector<4x1xf32>
      %c0_28 = arith.constant 0 : index
      %c0_29 = arith.constant 0 : index
      %c0_30 = arith.constant 0 : index
      %c0_31 = arith.constant 0 : index
      %48 = vector.load %arg5[%c0_28, %c0_29, %c0_30, %c0_31] : memref<1x1x4x1xf32, #tpu.memory_space<vmem>>, vector<1x1x4x1xf32>
      %49 = vector.shape_cast %48 : vector<1x1x4x1xf32> to vector<4x1xf32>
      %50 = vector.shape_cast %47 : vector<4x1xf32> to vector<1x1x4x1xf32>
      tpu.vector_store %arg5[%c0_28, %c0_29, %c0_30, %c0_31], %50 {strides = array<i32>} : memref<1x1x4x1xf32, #tpu.memory_space<vmem>>, vector<1x1x4x1xf32>,
      %cst_32 = arith.constant 0.000000e+00 : f32
      %51 = vector.broadcast %cst_32 : f32 to vector<4x1xf32>
      %c0_33 = arith.constant 0 : index
      %c0_34 = arith.constant 0 : index
      %c0_35 = arith.constant 0 : index
      %c0_36 = arith.constant 0 : index
      %52 = vector.load %arg6[%c0_33, %c0_34, %c0_35, %c0_36] : memref<1x1x4x1xf32, #tpu.memory_space<vmem>>, vector<1x1x4x1xf32>
      %53 = vector.shape_cast %52 : vector<1x1x4x1xf32> to vector<4x1xf32>
      %54 = vector.shape_cast %51 : vector<4x1xf32> to vector<1x1x4x1xf32>
      tpu.vector_store %arg6[%c0_33, %c0_34, %c0_35, %c0_36], %54 {strides = array<i32>} : memref<1x1x4x1xf32, #tpu.memory_space<vmem>>, vector<1x1x4x1xf32>,
    } else {
    }
    %c0 = arith.constant 0 : index
    %c0_1 = arith.constant 0 : index
    %c0_2 = arith.constant 0 : index
    %3 = vector.load %arg4[%c0, %c0_1, %c0_2] : memref<1x4x256xf32, #tpu.memory_space<vmem>>, vector<1x4x256xf32>
    %4 = vector.shape_cast %3 : vector<1x4x256xf32> to vector<4x256xf32>
    %c0_3 = arith.constant 0 : index
    %c0_4 = arith.constant 0 : index
    %c0_5 = arith.constant 0 : index
    %5 = vector.load %arg3[%c0_3, %c0_4, %c0_5] : memref<1x1x256xi8, #tpu.memory_space<vmem>>, vector<1x1x256xi8>
    %6 = vector.shape_cast %5 : vector<1x1x256xi8> to vector<1x256xi8>
    %7 = arith.extsi %6 : vector<1x256xi8> to vector<1x256xi32>
    %cst = arith.constant dense<0xFF800000> : vector<256xf32>
    %8 = vector.multi_reduction <maximumf>, %4, %cst [0] : vector<4x256xf32> to vector<256xf32>
    %9 = vector.shape_cast %8 : vector<256xf32> to vector<1x256xf32>
    %10 = vector.broadcast %9 : vector<1x256xf32> to vector<4x256xf32>
    %11 = arith.subf %4, %10 : vector<4x256xf32>
    %12 = math.exp %11 : vector<4x256xf32>
    %cst_6 = arith.constant dense<0.000000e+00> : vector<256xf32>
    %13 = vector.multi_reduction <add>, %12, %cst_6 [0] : vector<4x256xf32> to vector<256xf32>
    %14 = vector.shape_cast %13 : vector<256xf32> to vector<1x256xf32>
    %15 = tpu.reciprocal %14 {approx = true} : vector<1x256xf32> -> vector<1x256xf32>
    %16 = arith.mulf %14, %15 : vector<1x256xf32>
    %cst_7 = arith.constant 2.000000e+00 : f32
    %17 = vector.broadcast %cst_7 : f32 to vector<1x256xf32>
    %18 = arith.subf %17, %16 : vector<1x256xf32>
    %19 = arith.mulf %15, %18 : vector<1x256xf32>
    %20 = vector.broadcast %19 : vector<1x256xf32> to vector<4x256xf32>
    %21 = arith.mulf %12, %20 : vector<4x256xf32>
    %22 = tpu.iota {dimensions = array<i32: 0>} : vector<4x1xi32>
    %23 = vector.broadcast %22 : vector<4x1xi32> to vector<4x256xi32>
    %24 = vector.broadcast %7 : vector<1x256xi32> to vector<4x256xi32>
    %25 = arith.cmpi eq, %23, %24 : vector<4x256xi32>
    %c0_8 = arith.constant 0 : index
    %c0_9 = arith.constant 0 : index
    %c0_10 = arith.constant 0 : index
    %c0_11 = arith.constant 0 : index
    %26 = vector.load %arg5[%c0_8, %c0_9, %c0_10, %c0_11] : memref<1x1x4x1xf32, #tpu.memory_space<vmem>>, vector<1x1x4x1xf32>
    %27 = vector.shape_cast %26 : vector<1x1x4x1xf32> to vector<4x1xf32>
    %cst_12 = arith.constant 0.000000e+00 : f32
    %28 = vector.broadcast %cst_12 : f32 to vector<4x256xf32>
    %29 = arith.select %25, %21, %28 : vector<4x256xi1>, vector<4x256xf32>
    %cst_13 = arith.constant dense<0.000000e+00> : vector<4xf32>
    %30 = vector.multi_reduction <add>, %29, %cst_13 [1] : vector<4x256xf32> to vector<4xf32>
    %31 = vector.shape_cast %30 : vector<4xf32> to vector<4x1xf32>
    %32 = arith.addf %27, %31 : vector<4x1xf32>
    %c0_14 = arith.constant 0 : index
    %c0_15 = arith.constant 0 : index
    %c0_16 = arith.constant 0 : index
    %c0_17 = arith.constant 0 : index
    %33 = vector.load %arg5[%c0_14, %c0_15, %c0_16, %c0_17] : memref<1x1x4x1xf32, #tpu.memory_space<vmem>>, vector<1x1x4x1xf32>
    %34 = vector.shape_cast %33 : vector<1x1x4x1xf32> to vector<4x1xf32>
    %35 = vector.shape_cast %32 : vector<4x1xf32> to vector<1x1x4x1xf32>
    tpu.vector_store %arg5[%c0_14, %c0_15, %c0_16, %c0_17], %35 {strides = array<i32>} : memref<1x1x4x1xf32, #tpu.memory_space<vmem>>, vector<1x1x4x1xf32>,
    %c0_18 = arith.constant 0 : index
    %c0_19 = arith.constant 0 : index
    %c0_20 = arith.constant 0 : index
    %c0_21 = arith.constant 0 : index
    %36 = vector.load %arg6[%c0_18, %c0_19, %c0_20, %c0_21] : memref<1x1x4x1xf32, #tpu.memory_space<vmem>>, vector<1x1x4x1xf32>
    %37 = vector.shape_cast %36 : vector<1x1x4x1xf32> to vector<4x1xf32>
    %38 = arith.extui %25 : vector<4x256xi1> to vector<4x256xi32>
    %39 = arith.sitofp %38 : vector<4x256xi32> to vector<4x256xf32>
    %40 = arith.addf %21, %39 : vector<4x256xf32>
    %cst_22 = arith.constant dense<0.000000e+00> : vector<4xf32>
    %41 = vector.multi_reduction <add>, %40, %cst_22 [1] : vector<4x256xf32> to vector<4xf32>
    %42 = vector.shape_cast %41 : vector<4xf32> to vector<4x1xf32>
    %43 = arith.addf %37, %42 : vector<4x1xf32>
    %c0_23 = arith.constant 0 : index
    %c0_24 = arith.constant 0 : index
    %c0_25 = arith.constant 0 : index
    %c0_26 = arith.constant 0 : index
    %44 = vector.load %arg6[%c0_23, %c0_24, %c0_25, %c0_26] : memref<1x1x4x1xf32, #tpu.memory_space<vmem>>, vector<1x1x4x1xf32>
    %45 = vector.shape_cast %44 : vector<1x1x4x1xf32> to vector<4x1xf32>
    %46 = vector.shape_cast %43 : vector<4x1xf32> to vector<1x1x4x1xf32>
    tpu.vector_store %arg6[%c0_23, %c0_24, %c0_25, %c0_26], %46 {strides = array<i32>} : memref<1x1x4x1xf32, #tpu.memory_space<vmem>>, vector<1x1x4x1xf32>,
    return
  }
  func.func @transform_0(%arg0: i32, %arg1: i32, %arg2: i32) -> (i32, i32, i32) {
    %c1_i32 = arith.constant 1 : i32
    %0 = arith.muli %arg1, %c1_i32 : i32
    %1 = arith.addi %0, %arg2 : i32
    %c0_i32 = arith.constant 0 : i32
    %c0_i32_0 = arith.constant 0 : i32
    return %arg0, %c0_i32, %1 : i32, i32, i32
  }
  func.func @transform_1(%arg0: i32, %arg1: i32, %arg2: i32) -> (i32, i32, i32) {
    %c1_i32 = arith.constant 1 : i32
    %0 = arith.muli %arg1, %c1_i32 : i32
    %1 = arith.addi %0, %arg2 : i32
    %c0_i32 = arith.constant 0 : i32
    %c0_i32_0 = arith.constant 0 : i32
    return %arg0, %c0_i32, %1 : i32, i32, i32
  }
  func.func @transform_2(%arg0: i32, %arg1: i32, %arg2: i32) -> (i32, i32, i32, i32) {
    %c0_i32 = arith.constant 0 : i32
    %c0_i32_0 = arith.constant 0 : i32
    %c0_i32_1 = arith.constant 0 : i32
    return %arg0, %arg1, %c0_i32, %c0_i32_0 : i32, i32, i32, i32
  }
  func.func @transform_3(%arg0: i32, %arg1: i32, %arg2: i32) -> (i32, i32, i32, i32) {
    %c0_i32 = arith.constant 0 : i32
    %c0_i32_0 = arith.constant 0 : i32
    %c0_i32_1 = arith.constant 0 : i32
    return %arg0, %arg1, %c0_i32, %c0_i32_0 : i32, i32, i32, i32
  }
}

</mosaic_0001>

<bundles_post_ra>
// kernel: iou_loss.1
= control target key start
LH: loop header
LB: loop body
LE: loop exit
PB: predicated region body
PF: predicated region fallthrough
CT: control target
= control target key end

     0   :  { %s627_s12 = smov 0   ;;  %s629_s13 = smov 0   ;;  %s707_s0 = inlined_call_operand.vmem [shape: s8[2,1,256], index: 0, kind: input, shape index: {}]   ;;  %s708_s1 = inlined_call_operand.vmem [shape: f32[2,4,256], index: 1, kind: input, shape index: {}]   ;;  %s709_s2 = inlined_call_operand.vmem [shape: f32[2,1,4,1], index: 2, kind: output, shape index: {0}]   ;;  %s710_s3 = inlined_call_operand.vmem [shape: f32[2,1,4,1], index: 3, kind: output, shape index: {1}]  }
   0x1   :  { %s631_s14 = smov 0  }
   0x2 LB: > { %s33_s15 = sadd.s32 1, %s600_s13  ;;  %p540_p0 = scmp.ge.s32.totalorder %s604_s14, 1  ;;  %s604_s14 = sphi %s631_s14, %s14_s14   ;;  %s600_s13 = sphi %s629_s13, %s716_s13   ;;  %s596_s12 = sphi %s627_s12, %s715_s12  }
   0x3   : > { %p35_p1 = scmp.ge.s32.totalorder %s33_s15, 2  ;;  %p194_p2 = scmp.lt.s32.totalorder %s604_s14, 3 }
   0x5   : > { %s718_s15 = smov (%p35_p1, %s33_s15), 0  ;;  %p195_p3 = pnand %p540_p0, %p194_p2 }
   0x6   : > { %p243_p4 = scmp.lt.s32.totalorder (!%p195_p3), %s596_s12, 1 }
   0x7   : > { %198 = sbr.rel (%p195_p3) target bundleno = 230 (0xe6), region = 28 }
   0xc   : > { %s720_s12 = smov (!%p243_p4, %s596_s12), 1  ;;  %vm294_vm0 = vcmask 1043456   ;;  %v351_v40 = vlaneseq  ;;  %vm282_vm1 = vcmask 3072   ;;  %v606_v49 = vmov 0.0  }
   0xd   : > { %s550_s16 = sshll.u32 %s720_s12, 3  ;;  %s541_s20 = sshll.u32 %s720_s12, 1 }
   0xe   : > { %s261_s19 = scalar_lea.vmem %s708_s1, %s550_s16  ;;  %s249_s23 = scalar_lea.vmem %s707_s0, %s541_s20  ;;  %v352_v43 = vshrl.u32 %v351_v40, 7 }
   0xf   : > { %v285_v0 = vld [vmem:[%s261_s19] sm:$0xff]  ;;  %s544_s24 = sshll.u32 %s720_s12, 2 }
  0x10   : > { %289 = vst [vmem:[#allocation1] ss:$2 sm:$0xff] %v285_v0  ;;  %v286_v34 = vld [vmem:[%s249_s23] sm:$0x3]  ;;  %s664_s27 = scalar_lea.vmem %s709_s2, %s544_s24  ;;  %s277_s30 = scalar_lea.vmem %s710_s3, %s544_s24 }
  0x11   : > { %v287_v37 = vunpack.c.0.s8 %v286_v34  ;;  %283 = vst.msk [vmem:[%s664_s27] sm:$0xf] %vm282_vm1, %v606_v49 }
  0x12   : > { %284 = vst.msk [vmem:[%s277_s30] sm:$0xf] %vm282_vm1, %v606_v49 }
  0x13   : > { %v354_v41 = vperm.slane %v287_v37, 4  ;;  %v353_v44 = vperm.slane %v287_v37, 0 }
  0x15   : > { %v356_v45 = vperm.slane %v354_v41, 0  ;;  %v355_v52 = vperm.slane %v353_v44, 0 }
  0x17   : > { %v290_v1 = vld.sshfl [vmem:[#allocation1] sm:$0xff pattern:$0x75316420]  ;;  %v291_v2 = vld.sshfl [vmem:[#allocation1 + $0x8] sm:$0xff pattern:$0x75316420]  ;;  %vm668_vm2 = vcmp.eq.s32.totalorder %v352_v43, %v356_v45  ;;  %vm674_vm3 = vcmp.eq.s32.totalorder %v352_v43, %v355_v52 }
  0x18   : > { %v295_v3 = vsel %vm294_vm0, %v290_v1, -inf  ;;  %v302_v4 = vsel %vm294_vm0, %v291_v2, -inf  ;;  %v547_v56 = vsel %vm668_vm2, 1.0, %v606_v49  ;;  %v546_v62 = vsel %vm674_vm3, 1.0, %v606_v49 }
  0x19   : > { %v296_v5 = vrot.slane %v295_v3, 4  ;;  %v303_v6 = vrot.slane %v302_v4, 4  ;;  %v383_v60 = vrot.slane %v547_v56, 4 }
  0x1b   : > { %v297_v7 = vmax.f32 %v295_v3, %v296_v5  ;;  %v304_v8 = vmax.f32 %v302_v4, %v303_v6  ;;  %v384_v63 = vsel %vm294_vm0, %v546_v62, %v383_v60 }
  0x1d   : > { %v298_v9 = vrot.slane %v297_v7, 2  ;;  %v305_v10 = vrot.slane %v304_v8, 2 }
  0x1f   : > { %v299_v11 = vmax.f32 %v297_v7, %v298_v9  ;;  %v306_v12 = vmax.f32 %v304_v8, %v305_v10 }
  0x21   : > { %v300_v13 = vrot.slane %v299_v11, 1  ;;  %v307_v14 = vrot.slane %v306_v12, 1 }
  0x23   : > { %v301_v15 = vmax.f32 %v299_v11, %v300_v13  ;;  %v308_v16 = vmax.f32 %v306_v12, %v307_v14  ;;  %v359_v13 = vld [vmem:[%s664_s27] sm:$0xf] }
  0x25   : > { %v311_v17 = vrot.slane %v308_v16, 4  ;;  %v376_v16 = vld [vmem:[%s277_s30] sm:$0xf] }
  0x27   : > { %v312_v18 = vsel %vm294_vm0, %v301_v15, %v311_v17 }
  0x28   : > { %v314_v19 = vsub.f32 %v285_v0, %v312_v18 }
  0x2a   : > { %v315_v20 = vmul.f32 1.442695, %v314_v19 }
  0x2c   : > { %576 = vpow2.f32 %v315_v20 }
  0x32   : > { %v577_v21 = vpop.eup %576 }
  0x33   : > { %318 = vst [vmem:[#allocation1] ss:$2 sm:$0xff] %v577_v21 }
  0x3a   : > { %v319_v22 = vld.sshfl [vmem:[#allocation1] sm:$0xff pattern:$0x75316420]  ;;  %v320_v23 = vld.sshfl [vmem:[#allocation1 + $0x8] sm:$0xff pattern:$0x75316420] }
  0x3b   : > { %v323_v24 = vsel %vm294_vm0, %v319_v22, 0.0  ;;  %v330_v25 = vsel %vm294_vm0, %v320_v23, 0.0 }
  0x3c   : > { %v324_v26 = vrot.slane %v323_v24, 4  ;;  %v331_v27 = vrot.slane %v330_v25, 4 }
  0x3e   : > { %v325_v28 = vadd.f32 %v324_v26, %v323_v24  ;;  %v332_v29 = vadd.f32 %v331_v27, %v330_v25 }
  0x40   : > { %v326_v30 = vrot.slane %v325_v28, 2  ;;  %v333_v31 = vrot.slane %v332_v29, 2 }
  0x42   : > { %v327_v32 = vadd.f32 %v326_v30, %v325_v28  ;;  %v334_v33 = vadd.f32 %v333_v31, %v332_v29 }
  0x44   : > { %v328_v35 = vrot.slane %v327_v32, 1  ;;  %v335_v36 = vrot.slane %v334_v33, 1 }
  0x46   : > { %v329_v38 = vadd.f32 %v328_v35, %v327_v32  ;;  %v336_v39 = vadd.f32 %v335_v36, %v334_v33 }
  0x48   : > { %578 = vrcp.f32 %v329_v38 }
  0x49   : > { %580 = vrcp.f32 %v336_v39 }
  0x4e   : > { %v579_v42 = vpop.eup %578 }
  0x4f   : > { %v581_v46 = vpop.eup %580  ;;  %v339_v47 = vmul.f32 %v579_v42, %v329_v38 }
  0x50   : > { %v340_v48 = vmul.f32 %v581_v46, %v336_v39 }
  0x51   : > { %v341_v50 = vsub.f32 2.0, %v339_v47 }
  0x52   : > { %v342_v51 = vsub.f32 2.0, %v340_v48 }
  0x53   : > { %v343_v54 = vmul.f32 %v579_v42, %v341_v50 }
  0x54   : > { %v344_v55 = vmul.f32 %v581_v46, %v342_v51 }
  0x56   : > { %v347_v57 = vrot.slane %v344_v55, 4 }
  0x58   : > { %v348_v59 = vsel %vm294_vm0, %v343_v54, %v347_v57 }
  0x59   : > { %v350_v61 = vmul.f32 %v577_v21, %v348_v59 }
  0x5b   : > { %361 = vst [vmem:[#allocation1] ss:$2 sm:$0xff] %v350_v61  ;;  %v386_v0 = vadd.f32 %v384_v63, %v350_v61 }
  0x62   : > { %v362_v1 = vld.sshfl [vmem:[#allocation1] sm:$0xff pattern:$0x75316420]  ;;  %v363_v2 = vld.sshfl [vmem:[#allocation1 + $0x8] sm:$0xff pattern:$0x75316420] }
  0x63   : > { %v366_v3 = vsel %vm674_vm3, %v362_v1, 0.0  ;;  %v367_v4 = vsel %vm668_vm2, %v363_v2, 0.0  ;;  %388 = vst [vmem:[#allocation1] ss:$2 sm:$0xff] %v386_v0 }
  0x64   : > { %v368_v5 = vsel %vm294_vm0, %v366_v3, 0.0  ;;  %v369_v6 = vsel %vm294_vm0, %v367_v4, 0.0 }
  0x65   : > { %v370_v7 = vadd.f32 %v369_v6, %v368_v5 }
  0x67   : > { %371 = vadd.xlane.f32.xlu0 %v370_v7 }
  0x6a   : > { %v389_v8 = vld.sshfl [vmem:[#allocation1] sm:$0xff pattern:$0x75316420]  ;;  %v390_v9 = vld.sshfl [vmem:[#allocation1 + $0x8] sm:$0xff pattern:$0x75316420] }
  0x6b   : > { %v393_v10 = vsel %vm294_vm0, %v389_v8, 0.0  ;;  %v394_v11 = vsel %vm294_vm0, %v390_v9, 0.0 }
  0x6c   : > { %v395_v12 = vadd.f32 %v394_v11, %v393_v10 }
  0x6f   : > { %396 = vadd.xlane.f32.xlu0 %v395_v12 }
  0xda   : > { %v372_v14 = vpop.xlane.xlu0 %371 }
  0xdb   : > { %v373_v15 = vadd.f32 %v372_v14, %v359_v13 }
  0xdd   : > { %375 = vst.msk [vmem:[%s664_s27] sm:$0xf] %vm282_vm1, %v373_v15 }
  0xe2   : > { %v397_v17 = vpop.xlane.xlu0 %396 }
  0xe3   : > { %v398_v18 = vadd.f32 %v397_v17, %v376_v16 }
  0xe5   : > { %399 = vst.msk [vmem:[%s277_s30] sm:$0xf] %vm282_vm1, %v398_v18 }
  0xe6 PF: > { %s14_s14 = sadd.s32 1, %s604_s14   ;;  %s715_s12 = smov %s600_s13 }
  0xe7   : > { %p11_p5 = scmp.ge.s32.totalorder %s14_s14, 4   ;;  %s716_s13 = smov %s718_s15 }
  0xe9   :  { %13 = sbr.rel (!%p11_p5) target bundleno = 2 (0x2), region = 77 }

</bundles_post_ra>
